<compile_context>
chip_gen: v7x
topology: tpu7x:2x2x1
jax: 0.10.0
libtpu: 0.0.40
codegen_flags: <defaults>
</compile_context>

<pallas_src>
import jax
import jax.numpy as jnp
import numpy as np
from jax import lax
from jax.experimental import pallas as pl
from jax.experimental.pallas import tpu as pltpu


# --------------------- lowered (block-Toeplitz) conv weights, per-kh ---------------------
# TODO(synk): dense per-kh slabs are O(W^2 * Cin * Cout); for production feature-map sizes
# (W >= 64) tile Wh over a grid axis or switch to per-(kh,kw) Cin-dense weight bands.
def lower_conv3x3_slabs(w_hwio, *, in_lanes, p_stride, w_out):
    """Per-kh block-Toeplitz slabs for a 3x3 'SAME' conv on lane-flattened rows.

    Returns A of shape (3, in_lanes, w_out*Co) such that, with v[r, :] a lane-flattened
    input row (input column p lives at lanes [p*p_stride, p*p_stride+Ci); out-of-range
    p == zero padding), sum_k kh_shift_k(v) @ A[k] is the conv output row with lane
    layout wo*Co + co.
    """
    w = np.asarray(w_hwio, np.float32)
    KH, KW, Ci, Co = w.shape
    assert KH == 3 and KW == 3
    A = np.zeros((KH, in_lanes, w_out * Co), np.float32)
    for kh in range(KH):
        for kw in range(KW):
            for wo in range(w_out):
                p = wo + kw - 1                          # input column read by output col wo
                if 0 <= p < w_out:                       # out-of-range == zero padding
                    A[kh, p * p_stride:p * p_stride + Ci, wo * Co:(wo + 1) * Co] = w[kh, kw]
    return A


def prepare_down_params(w1, b1, w2, b2, H, W):
    """Host-side, once per weight set: lowered conv weights + lane-tiled biases."""
    assert H % 2 == 0 and W % 2 == 0, "Down assumes even spatial dims (MaxPool2d(2))"
    Cin, Cmid = w1.shape[2], w1.shape[3]
    Cout = w2.shape[3]
    Wh = W // 2
    # conv1 reads the pooled rows, whose valid columns sit at even-w lane groups -> stride 2*Cin.
    a1 = lower_conv3x3_slabs(w1, in_lanes=W * Cin, p_stride=2 * Cin, w_out=Wh)
    a2 = lower_conv3x3_slabs(w2, in_lanes=Wh * Cmid, p_stride=Cmid, w_out=Wh)
    b1r = np.tile(np.asarray(b1, np.float32), Wh).reshape(1, Wh * Cmid)
    b2r = np.tile(np.asarray(b2, np.float32), Wh).reshape(1, Wh * Cout)
    return jnp.asarray(a1), jnp.asarray(b1r), jnp.asarray(a2), jnp.asarray(b2r)


# ------------------------------ fused Down kernel --------------------------------
def _make_down_kernel(N, H, W, Cin, Cmid, Cout):
    Hh, Wh = H // 2, W // 2
    M = N * Hh                       # batch folded into sublanes
    Wf1 = W * Cin

    def kernel(x_ref, a1_ref, b1_ref, a2_ref, b2_ref, o_ref):
        f32 = jnp.float32
        x = x_ref[...]                                    # (M, 2*Wf1): one h-pair per row

        # ---- MaxPool2d(2) ----
        hmax = jnp.maximum(x[:, :Wf1], x[:, Wf1:])        # vertical max of the h-pair
        # horizontal neighbour via lane rotation (roll by Wf1-Cin == shift left by Cin lanes)
        pooled = jnp.maximum(hmax, pltpu.roll(hmax, Wf1 - Cin, axis=1))
        # NOTE: `pooled` is only valid at even-w lane groups (lane = 2*p*Cin + ci).  The
        # Toeplitz slabs a1 (p_stride = 2*Cin) have zero rows everywhere else, so the
        # garbage at odd-w groups — including the roll's circular wrap — is never read.

        # ---- per-image kh-shift masks (batch lives on the sublane axis) ----
        hmod = lax.broadcasted_iota(jnp.int32, (M, 1), 0) % Hh
        not_top = (hmod != 0).astype(f32)        # zeroes row h == 0    of every image
        not_bot = (hmod != Hh - 1).astype(f32)   # zeroes row h == Hh-1 of every image

        def conv3x3_relu(v, a_ref, b_ref):
            # kh = 1 : same row
            acc = jnp.dot(v, a_ref[1], preferred_element_type=f32)
            # kh = 0 : needs row h-1 -> roll rows down by one, zero first row per image
            acc += jnp.dot(pltpu.roll(v, 1, axis=0) * not_top, a_ref[0],
                           preferred_element_type=f32)
            # kh = 2 : needs row h+1 -> roll rows up by one (shift M-1), zero last row per image
            acc += jnp.dot(pltpu.roll(v, M - 1, axis=0) * not_bot, a_ref[2],
                           preferred_element_type=f32)
            return jnp.maximum(acc + b_ref[...], 0.0)

        h1 = conv3x3_relu(pooled, a1_ref, b1_ref)         # (M, Wh*Cmid)
        h2 = conv3x3_relu(h1, a2_ref, b2_ref)             # (M, Wh*Cout)
        # Output is 64 lanes wide (masked stores) but only 4 KiB total at this size.
        o_ref[...] = h2.astype(o_ref.dtype)

    return kernel


# --------------------------------- Down.forward -----------------------------------
@jax.jit
def down_forward(x_nchw, a1, b1r, a2, b2r):
    N, Cin, H, W = x_nchw.shape
    assert H % 2 == 0 and W % 2 == 0, "Down assumes even spatial dims (MaxPool2d(2))"
    Hh, Wh = H // 2, W // 2
    Cmid = b1r.shape[1] // Wh
    Cout = b2r.shape[1] // Wh

    # NCHW -> NHWC -> (N*Hh, 2*W*Cin): one vertical h-pair per row, lane-dense (128-wide) load.
    x2d = jnp.transpose(x_nchw, (0, 2, 3, 1)).reshape(N * Hh, 2 * W * Cin)

    kernel = _make_down_kernel(N, H, W, Cin, Cmid, Cout)
    vmem = pl.BlockSpec(memory_space=pltpu.MemorySpace.VMEM)
    out = pl.pallas_call(
        kernel,
        out_shape=jax.ShapeDtypeStruct((N * Hh, Wh * Cout), x_nchw.dtype),
        in_specs=[vmem, vmem, vmem, vmem, vmem],
        out_specs=vmem,
    )(x2d, a1, b1r, a2, b2r)

    # (N*Hh, Wh*Cout) -> NCHW (free reshape + small transpose; interface glue only).
    return jnp.transpose(out.reshape(N, Hh, Wh, Cout), (0, 3, 1, 2))


# ------------------------------ pure-JAX reference --------------------------------
def down_forward_ref(x_nchw, w1, b1, w2, b2):
    x = jnp.transpose(x_nchw, (0, 2, 3, 1))
    x = lax.reduce_window(x, -jnp.inf, lax.max, (1, 2, 2, 1), (1, 2, 2, 1), "VALID")
    for w, b in ((w1, b1), (w2, b2)):
        dn = lax.conv_dimension_numbers(x.shape, w.shape, ("NHWC", "HWIO", "NHWC"))
        x = jax.nn.relu(
            lax.conv_general_dilated(x, w, (1, 1), "SAME", dimension_numbers=dn) + b)
    return jnp.transpose(x, (0, 3, 1, 2))


if __name__ == "__main__":
    # Down(in_channels=4, out_channels=8); input NCHW (2, 4, 16, 16)
    N, Cin, H, W = 2, 4, 16, 16
    Cout = 8

    key = jax.random.PRNGKey(0)
    kx, kw1, kb1, kw2, kb2 = jax.random.split(key, 5)
    x = jax.random.normal(kx, (N, Cin, H, W), dtype=jnp.float32)
    w1 = jax.random.normal(kw1, (3, 3, Cin, Cout), dtype=jnp.float32) * 0.1   # HWIO
    b1 = jax.random.normal(kb1, (Cout,), dtype=jnp.float32) * 0.1
    w2 = jax.random.normal(kw2, (3, 3, Cout, Cout), dtype=jnp.float32) * 0.1  # HWIO
    b2 = jax.random.normal(kb2, (Cout,), dtype=jnp.float32) * 0.1

    # Weight lowering is done once per weight set, outside the per-call (jitted) path.
    params = prepare_down_params(w1, b1, w2, b2, H, W)

    out = jax.block_until_ready(down_forward(x, *params))
    ref = jax.block_until_ready(down_forward_ref(x, w1, b1, w2, b2))
    np.testing.assert_allclose(np.asarray(out), np.asarray(ref), rtol=1e-4, atol=1e-4)
    assert out.shape == (N, Cout, H // 2, W // 2)

    print("KERNEL_OK")
</pallas_src>

<mosaic_0001>
module attributes {stable_mosaic.version = 11 : i64} {
  func.func @kernel(%arg0: memref<16x128xf32, #tpu.memory_space<vmem>>, %arg1: memref<3x64x64xf32, #tpu.memory_space<vmem>>, %arg2: memref<1x64xf32, #tpu.memory_space<vmem>>, %arg3: memref<3x64x64xf32, #tpu.memory_space<vmem>>, %arg4: memref<1x64xf32, #tpu.memory_space<vmem>>, %arg5: memref<16x64xf32, #tpu.memory_space<vmem>>) attributes {dimension_semantics = [], scalar_prefetch = 0 : i64, scratch_operands = 0 : i64, tpu.core_type = #tpu.core_type<tc>} {
    %c0 = arith.constant 0 : index
    %c0_0 = arith.constant 0 : index
    %0 = vector.load %arg0[%c0, %c0_0] : memref<16x128xf32, #tpu.memory_space<vmem>>, vector<16x128xf32>
    %1 = vector.extract_strided_slice %0 {offsets = [0, 0], sizes = [16, 64], strides = [1, 1]} : vector<16x128xf32> to vector<16x64xf32>
    %2 = vector.extract_strided_slice %0 {offsets = [0, 64], sizes = [16, 64], strides = [1, 1]} : vector<16x128xf32> to vector<16x64xf32>
    %3 = arith.maximumf %1, %2 : vector<16x64xf32>
    %c60_i32 = arith.constant 60 : i32
    %4 = tpu.dynamic_rotate %3 by %c60_i32 dim 1 : vector<16x64xf32>, i32 -> vector<16x64xf32>
    %5 = arith.maximumf %3, %4 : vector<16x64xf32>
    %6 = tpu.iota {dimensions = array<i32: 0>} : vector<16x1xi32>
    %c8_i32 = arith.constant 8 : i32
    %c0_i32 = arith.constant 0 : i32
    %7 = arith.cmpi eq, %c8_i32, %c0_i32 : i32
    %c1_i32 = arith.constant 1 : i32
    %8 = arith.select %7, %c1_i32, %c8_i32 : i32
    %9 = vector.broadcast %8 : i32 to vector<16x1xi32>
    %10 = arith.remsi %6, %9 : vector<16x1xi32>
    %c0_i32_1 = arith.constant 0 : i32
    %11 = vector.broadcast %c0_i32_1 : i32 to vector<16x1xi32>
    %12 = arith.cmpi ne, %10, %11 : vector<16x1xi32>
    %c0_i32_2 = arith.constant 0 : i32
    %13 = vector.broadcast %c0_i32_2 : i32 to vector<16x1xi32>
    %14 = arith.cmpi slt, %10, %13 : vector<16x1xi32>
    %c0_i32_3 = arith.constant 0 : i32
    %15 = arith.cmpi slt, %8, %c0_i32_3 : i32
    %16 = vector.broadcast %15 : i1 to vector<16x1xi1>
    %17 = vector.broadcast %16 : vector<16x1xi1> to vector<16x1xi1>
    %18 = arith.xori %14, %17 : vector<16x1xi1>
    %19 = arith.andi %18, %12 : vector<16x1xi1>
    %20 = vector.broadcast %8 : i32 to vector<16x1xi32>
    %21 = arith.addi %10, %20 : vector<16x1xi32>
    %22 = arith.select %19, %21, %10 : vector<16x1xi1>, vector<16x1xi32>
    %c0_i32_4 = arith.constant 0 : i32
    %23 = vector.broadcast %c0_i32_4 : i32 to vector<16x1xi32>
    %24 = arith.cmpi ne, %22, %23 : vector<16x1xi32>
    %25 = arith.extui %24 : vector<16x1xi1> to vector<16x1xi32>
    %26 = arith.sitofp %25 : vector<16x1xi32> to vector<16x1xf32>
    %c7_i32 = arith.constant 7 : i32
    %27 = vector.broadcast %c7_i32 : i32 to vector<16x1xi32>
    %28 = arith.cmpi ne, %22, %27 : vector<16x1xi32>
    %29 = arith.extui %28 : vector<16x1xi1> to vector<16x1xi32>
    %30 = arith.sitofp %29 : vector<16x1xi32> to vector<16x1xf32>
    %c1 = arith.constant 1 : index
    %c0_5 = arith.constant 0 : index
    %c0_6 = arith.constant 0 : index
    %31 = vector.load %arg1[%c1, %c0_5, %c0_6] : memref<3x64x64xf32, #tpu.memory_space<vmem>>, vector<1x64x64xf32>
    %32 = vector.shape_cast %31 : vector<1x64x64xf32> to vector<64x64xf32>
    %cst = arith.constant dense<0.000000e+00> : vector<16x64xf32>
    %33 = tpu.matmul %5, %32, %cst {dimension_numbers = #tpu.dot_dimension_numbers<[1], [0], [0], [1], [0, 0, 1, 1], [], []>} : vector<16x64xf32>, vector<64x64xf32>, vector<16x64xf32> -> vector<16x64xf32>
    %c1_i32_7 = arith.constant 1 : i32
    %34 = tpu.dynamic_rotate %5 by %c1_i32_7 dim 0 : vector<16x64xf32>, i32 -> vector<16x64xf32>
    %35 = vector.broadcast %26 : vector<16x1xf32> to vector<16x64xf32>
    %36 = arith.mulf %34, %35 : vector<16x64xf32>
    %c0_8 = arith.constant 0 : index
    %c0_9 = arith.constant 0 : index
    %c0_10 = arith.constant 0 : index
    %37 = vector.load %arg1[%c0_8, %c0_9, %c0_10] : memref<3x64x64xf32, #tpu.memory_space<vmem>>, vector<1x64x64xf32>
    %38 = vector.shape_cast %37 : vector<1x64x64xf32> to vector<64x64xf32>
    %cst_11 = arith.constant dense<0.000000e+00> : vector<16x64xf32>
    %39 = tpu.matmul %36, %38, %cst_11 {dimension_numbers = #tpu.dot_dimension_numbers<[1], [0], [0], [1], [0, 0, 1, 1], [], []>} : vector<16x64xf32>, vector<64x64xf32>, vector<16x64xf32> -> vector<16x64xf32>
    %40 = arith.addf %33, %39 : vector<16x64xf32>
    %c15_i32 = arith.constant 15 : i32
    %41 = tpu.dynamic_rotate %5 by %c15_i32 dim 0 : vector<16x64xf32>, i32 -> vector<16x64xf32>
    %42 = vector.broadcast %30 : vector<16x1xf32> to vector<16x64xf32>
    %43 = arith.mulf %41, %42 : vector<16x64xf32>
    %c2 = arith.constant 2 : index
    %c0_12 = arith.constant 0 : index
    %c0_13 = arith.constant 0 : index
    %44 = vector.load %arg1[%c2, %c0_12, %c0_13] : memref<3x64x64xf32, #tpu.memory_space<vmem>>, vector<1x64x64xf32>
    %45 = vector.shape_cast %44 : vector<1x64x64xf32> to vector<64x64xf32>
    %cst_14 = arith.constant dense<0.000000e+00> : vector<16x64xf32>
    %46 = tpu.matmul %43, %45, %cst_14 {dimension_numbers = #tpu.dot_dimension_numbers<[1], [0], [0], [1], [0, 0, 1, 1], [], []>} : vector<16x64xf32>, vector<64x64xf32>, vector<16x64xf32> -> vector<16x64xf32>
    %47 = arith.addf %40, %46 : vector<16x64xf32>
    %c0_15 = arith.constant 0 : index
    %c0_16 = arith.constant 0 : index
    %48 = vector.load %arg2[%c0_15, %c0_16] : memref<1x64xf32, #tpu.memory_space<vmem>>, vector<1x64xf32>
    %49 = vector.broadcast %48 : vector<1x64xf32> to vector<16x64xf32>
    %50 = arith.addf %47, %49 : vector<16x64xf32>
    %cst_17 = arith.constant 0.000000e+00 : f32
    %51 = vector.broadcast %cst_17 : f32 to vector<16x64xf32>
    %52 = arith.maximumf %50, %51 : vector<16x64xf32>
    %c1_18 = arith.constant 1 : index
    %c0_19 = arith.constant 0 : index
    %c0_20 = arith.constant 0 : index
    %53 = vector.load %arg3[%c1_18, %c0_19, %c0_20] : memref<3x64x64xf32, #tpu.memory_space<vmem>>, vector<1x64x64xf32>
    %54 = vector.shape_cast %53 : vector<1x64x64xf32> to vector<64x64xf32>
    %cst_21 = arith.constant dense<0.000000e+00> : vector<16x64xf32>
    %55 = tpu.matmul %52, %54, %cst_21 {dimension_numbers = #tpu.dot_dimension_numbers<[1], [0], [0], [1], [0, 0, 1, 1], [], []>} : vector<16x64xf32>, vector<64x64xf32>, vector<16x64xf32> -> vector<16x64xf32>
    %c1_i32_22 = arith.constant 1 : i32
    %56 = tpu.dynamic_rotate %52 by %c1_i32_22 dim 0 : vector<16x64xf32>, i32 -> vector<16x64xf32>
    %57 = vector.broadcast %26 : vector<16x1xf32> to vector<16x64xf32>
    %58 = arith.mulf %56, %57 : vector<16x64xf32>
    %c0_23 = arith.constant 0 : index
    %c0_24 = arith.constant 0 : index
    %c0_25 = arith.constant 0 : index
    %59 = vector.load %arg3[%c0_23, %c0_24, %c0_25] : memref<3x64x64xf32, #tpu.memory_space<vmem>>, vector<1x64x64xf32>
    %60 = vector.shape_cast %59 : vector<1x64x64xf32> to vector<64x64xf32>
    %cst_26 = arith.constant dense<0.000000e+00> : vector<16x64xf32>
    %61 = tpu.matmul %58, %60, %cst_26 {dimension_numbers = #tpu.dot_dimension_numbers<[1], [0], [0], [1], [0, 0, 1, 1], [], []>} : vector<16x64xf32>, vector<64x64xf32>, vector<16x64xf32> -> vector<16x64xf32>
    %62 = arith.addf %55, %61 : vector<16x64xf32>
    %c15_i32_27 = arith.constant 15 : i32
    %63 = tpu.dynamic_rotate %52 by %c15_i32_27 dim 0 : vector<16x64xf32>, i32 -> vector<16x64xf32>
    %64 = vector.broadcast %30 : vector<16x1xf32> to vector<16x64xf32>
    %65 = arith.mulf %63, %64 : vector<16x64xf32>
    %c2_28 = arith.constant 2 : index
    %c0_29 = arith.constant 0 : index
    %c0_30 = arith.constant 0 : index
    %66 = vector.load %arg3[%c2_28, %c0_29, %c0_30] : memref<3x64x64xf32, #tpu.memory_space<vmem>>, vector<1x64x64xf32>
    %67 = vector.shape_cast %66 : vector<1x64x64xf32> to vector<64x64xf32>
    %cst_31 = arith.constant dense<0.000000e+00> : vector<16x64xf32>
    %68 = tpu.matmul %65, %67, %cst_31 {dimension_numbers = #tpu.dot_dimension_numbers<[1], [0], [0], [1], [0, 0, 1, 1], [], []>} : vector<16x64xf32>, vector<64x64xf32>, vector<16x64xf32> -> vector<16x64xf32>
    %69 = arith.addf %62, %68 : vector<16x64xf32>
    %c0_32 = arith.constant 0 : index
    %c0_33 = arith.constant 0 : index
    %70 = vector.load %arg4[%c0_32, %c0_33] : memref<1x64xf32, #tpu.memory_space<vmem>>, vector<1x64xf32>
    %71 = vector.broadcast %70 : vector<1x64xf32> to vector<16x64xf32>
    %72 = arith.addf %69, %71 : vector<16x64xf32>
    %cst_34 = arith.constant 0.000000e+00 : f32
    %73 = vector.broadcast %cst_34 : f32 to vector<16x64xf32>
    %74 = arith.maximumf %72, %73 : vector<16x64xf32>
    %c0_35 = arith.constant 0 : index
    %c0_36 = arith.constant 0 : index
    %75 = vector.load %arg5[%c0_35, %c0_36] : memref<16x64xf32, #tpu.memory_space<vmem>>, vector<16x64xf32>
    tpu.vector_store %arg5[%c0_35, %c0_36], %74 {strides = array<i32>} : memref<16x64xf32, #tpu.memory_space<vmem>>, vector<16x64xf32>,
    return
  }
}

</mosaic_0001>

<bundles_post_ra>
// kernel: down_forward.1
= control target key start
LH: loop header
LB: loop body
LE: loop exit
PB: predicated region body
PF: predicated region fallthrough
CT: control target
= control target key end

     0   :  { %s1022_s20 = smov 64   ;;  %vm32_vm0 = vcmask 1048064   ;;  %s1023_s17 = smov 124   ;;  %v55_v35 = vlaneseq  ;;  %v1024_v46 = vmov 0.0   ;;  %vm118_vm4 = vcmask 523264   ;;  %s1281_s0 = inlined_call_operand.vmem [shape: f32[16,128], index: 0, kind: input, shape index: {}]   ;;  %s1282_s1 = inlined_call_operand.vmem [shape: f32[3,64,64], index: 1, kind: input, shape index: {}]   ;;  %s1283_s3 = inlined_call_operand.vmem [shape: f32[3,64,64], index: 3, kind: input, shape index: {}]   ;;  %s1284_s2 = inlined_call_operand.vmem [shape: f32[1,64], index: 2, kind: input, shape index: {}]   ;;  %s1285_s4 = inlined_call_operand.vmem [shape: f32[1,64], index: 4, kind: input, shape index: {}]   ;;  %s1286_s5 = inlined_call_operand.vmem [shape: f32[16,64], index: 5, kind: output, shape index: {}]  }
   0x1   :  { %v20_v0 = vld [vmem:[%s1281_s0] sm:$0xff]  ;;  %v21_v1 = vld [vmem:[%s1281_s0 + $0x8] sm:$0xff]  ;;  %v112_v8 = vld [vmem:[%s1282_s1 + $0x10] sm:$0xff] }
   0x2   :  { %24 = vrot.lane.b32.xlu0 %v20_v0, %s1022_s20  ;;  %v110_v6 = vld [vmem:[%s1282_s1] sm:$0xff]  ;;  %v111_v7 = vld [vmem:[%s1282_s1 + $0x8] sm:$0xff]  ;;  %v113_v10 = vld [vmem:[%s1282_s1 + $0x18] sm:$0xff]  ;;  %v1107_v36 = vshrl.u32 %v55_v35, 7 }
   0x3   :  { %v915_v9 = vpack.c.bf16 %v111_v7, %v110_v6  ;;  %v919_v11 = vpack.c.bf16 %v113_v10, %v112_v8  ;;  %v114_v16 = vld [vmem:[%s1282_s1 + $0x20] sm:$0xff]  ;;  %v115_v17 = vld [vmem:[%s1282_s1 + $0x28] sm:$0xff]  ;;  %v116_v19 = vld [vmem:[%s1282_s1 + $0x30] sm:$0xff] }
   0x4   :  { %v923_v18 = vpack.c.bf16 %v115_v17, %v114_v16  ;;  %v117_v20 = vld [vmem:[%s1282_s1 + $0x38] sm:$0xff]  ;;  %v695_v22 = vld [vmem:[%s1282_s1 + $0x40] sm:$0xff]  ;;  %v696_v23 = vld [vmem:[%s1282_s1 + $0x48] sm:$0xff]  ;;  %v1110_v37 = vadd.s32 8, %v1107_v36  ;;  %v62_v39 = vand.u32 7, %v1107_v36  ;;  %vm105_vm3 = vcmp.lt.s32.totalorder %v1107_v36, 1 }
   0x5   :  { %916 = vmatprep.subr.bf16.mxu0 %v915_v9  ;;  %v927_v21 = vpack.c.bf16 %v117_v20, %v116_v19  ;;  %v931_v24 = vpack.c.bf16 %v696_v23, %v695_v22  ;;  %v406_v29 = vld [vmem:[%s1283_s3] sm:$0xff]  ;;  %v407_v30 = vld [vmem:[%s1283_s3 + $0x8] sm:$0xff]  ;;  %v408_v31 = vld [vmem:[%s1283_s3 + $0x10] sm:$0xff]  ;;  %vm283_vm5 = vcmp.lt.s32.totalorder %v1107_v36, 7 }
   0x6   :  { %26 = vrot.lane.b32.xlu0 %v21_v1, %s1022_s20  ;;  %918 = vmatpush3.bf16.msra.mxu0 %v915_v9  ;;  %v963_v32 = vpack.c.bf16 %v407_v30, %v406_v29  ;;  %v409_v33 = vld [vmem:[%s1283_s3 + $0x18] sm:$0xff]  ;;  %v69_v40 = vand.u32 7, %v1110_v37  ;;  %vm82_vm1 = vcmp.ne.s32.totalorder %v62_v39, 0  ;;  %v697_v49 = vld [vmem:[%s1282_s1 + $0x50] sm:$0xff]  ;;  %v699_v56 = vld [vmem:[%s1282_s1 + $0x60] sm:$0xff]  ;;  %vm88_vm6 = vcmp.ne.s32.totalorder %v62_v39, 7 }
   0x7   :  { %920 = vmatprep.subr.bf16.mxu0 %v919_v11  ;;  %v967_v34 = vpack.c.bf16 %v409_v33, %v408_v31  ;;  %v1118_v47 = vsel %vm82_vm1, 1.0, %v1024_v46  ;;  %v698_v50 = vld [vmem:[%s1282_s1 + $0x58] sm:$0xff]  ;;  %v700_v57 = vld [vmem:[%s1282_s1 + $0x68] sm:$0xff]  ;;  %v701_v59 = vld [vmem:[%s1282_s1 + $0x70] sm:$0xff] }
   0x8   :  { %964 = vmatprep.subr.bf16.mxu1 %v963_v32  ;;  %vm83_vm2 = vcmp.ne.s32.totalorder %v69_v40, 0  ;;  %v935_v55 = vpack.c.bf16 %v698_v50, %v697_v49  ;;  %v939_v58 = vpack.c.bf16 %v700_v57, %v699_v56  ;;  %v702_v60 = vld [vmem:[%s1282_s1 + $0x78] sm:$0xff]  ;;  %v707_v62 = vld [vmem:[%s1282_s1 + $0x80] sm:$0xff]  ;;  %v708_v63 = vld [vmem:[%s1282_s1 + $0x88] sm:$0xff]  ;;  %vm89_vm7 = vcmp.ne.s32.totalorder %v69_v40, 7 }
   0x9   :  { %966 = vmatpush3.bf16.msra.mxu1 %v963_v32  ;;  %v1120_v48 = vsel %vm83_vm2, 1.0, %v1024_v46  ;;  %v943_v61 = vpack.c.bf16 %v702_v60, %v701_v59  ;;  %v711_v9 = vld [vmem:[%s1282_s1 + $0xa0] sm:$0xff]  ;;  %v712_v10 = vld [vmem:[%s1282_s1 + $0xa8] sm:$0xff]  ;;  %v1185_v16 = vsel %vm89_vm7, 1.0, %v1024_v46  ;;  %v413_v22 = vld [vmem:[%s1283_s3 + $0x38] sm:$0xff] }
   0xa   :  { %922 = vmatpush3.bf16.msra.mxu0 %v919_v11  ;;  %968 = vmatprep.subr.bf16.mxu1 %v967_v34  ;;  %v955_v11 = vpack.c.bf16 %v712_v10, %v711_v9  ;;  %v411_v19 = vld [vmem:[%s1283_s3 + $0x28] sm:$0xff]  ;;  %v720_v39 = vld [vmem:[%s1283_s3 + $0x50] sm:$0xff]  ;;  %v721_v40 = vld [vmem:[%s1283_s3 + $0x58] sm:$0xff] }
   0xb   :  { %924 = vmatprep.subr.bf16.mxu0 %v923_v18  ;;  %v983_v49 = vpack.c.bf16 %v721_v40, %v720_v39  ;;  %v722_v50 = vld [vmem:[%s1283_s3 + $0x60] sm:$0xff]  ;;  %v732_v56 = vld [vmem:[%s1283_s3 + $0x90] sm:$0xff]  ;;  %v733_v57 = vld [vmem:[%s1283_s3 + $0x98] sm:$0xff] }
   0xc   :  { %v734_v60 = vld [vmem:[%s1283_s3 + $0xa0] sm:$0xff] }
   0xd   :  { %970 = vmatpush3.bf16.msra.mxu1 %v967_v34 }
   0xe   :  { %926 = vmatpush3.bf16.msra.mxu0 %v923_v18  ;;  %v410_v18 = vld [vmem:[%s1283_s3 + $0x20] sm:$0xff] }
   0xf   :  { %928 = vmatprep.subr.bf16.mxu0 %v927_v21  ;;  %v971_v20 = vpack.c.bf16 %v411_v19, %v410_v18 }
  0x11   :  { %972 = vmatprep.subr.bf16.mxu1 %v971_v20 }
  0x12   :  { %930 = vmatpush3.bf16.msra.mxu0 %v927_v21  ;;  %974 = vmatpush3.bf16.msra.mxu1 %v971_v20  ;;  %v412_v21 = vld [vmem:[%s1283_s3 + $0x30] sm:$0xff] }
  0x13   :  { %932 = vmatprep.subr.bf16.mxu0 %v931_v24  ;;  %v975_v23 = vpack.c.bf16 %v413_v22, %v412_v21 }
  0x15   :  { %976 = vmatprep.subr.bf16.mxu1 %v975_v23 }
  0x16   :  { %978 = vmatpush3.bf16.msra.mxu1 %v975_v23 }
  0x74   :  { %v25_v2 = vpop.permute.xlu0 %24 }
  0x75   :  { %v30_v3 = vmax.f32 %v20_v0, %v25_v2  ;;  %v947_v2 = vpack.c.bf16 %v708_v63, %v707_v62  ;;  %v736_v63 = vld [vmem:[%s1283_s3 + $0xb0] sm:$0xff] }
  0x77   :  { %33 = vrot.lane.b32.xlu1 %v30_v3, %s1022_s20 }
  0x78   :  { %v27_v4 = vpop.permute.xlu0 %26 }
  0x79   :  { %v31_v5 = vmax.f32 %v21_v1, %v27_v4  ;;  %v710_v4 = vld [vmem:[%s1282_s1 + $0x98] sm:$0xff] }
  0x7b   :  { %36 = vrot.lane.b32.xlu1 %v31_v5, %s1022_s20 }
  0xe9   :  { %v34_v12 = vpop.permute.xlu1 %33 }
  0xea   :  { %v35_v13 = vsel %vm32_vm0, %v34_v12, %v30_v3  ;;  %v713_v12 = vld [vmem:[%s1282_s1 + $0xb0] sm:$0xff] }
  0xeb   :  { %39 = vrot.lane.b32.xlu0 %v35_v13, %s1022_s20  ;;  %v714_v13 = vld [vmem:[%s1282_s1 + $0xb8] sm:$0xff] }
  0xed   :  { %v37_v14 = vpop.permute.xlu1 %36 }
  0xee   :  { %v38_v15 = vsel %vm32_vm0, %v37_v14, %v31_v5  ;;  %v959_v14 = vpack.c.bf16 %v714_v13, %v713_v12 }
  0xef   :  { %41 = vrot.lane.b32.xlu1 %v38_v15, %s1022_s20 }
 0x15d   :  { %v40_v25 = vpop.permute.xlu0 %39 }
 0x15e   :  { %v43_v26 = vsel %vm32_vm0, %v40_v25, %v30_v3  ;;  %v719_v25 = vld [vmem:[%s1283_s3 + $0x48] sm:$0xff] }
 0x15f   :  { %47 = vrot.lane.b32.xlu0 %v43_v26, %s1023_s17 }
 0x161   :  { %v42_v27 = vpop.permute.xlu1 %41 }
 0x162   :  { %v44_v28 = vsel %vm32_vm0, %v42_v27, %v31_v5  ;;  %v717_v27 = vld [vmem:[%s1284_s2] ss:$0 sm:$0xff] }
 0x163   :  { %49 = vrot.lane.b32.xlu1 %v44_v28, %s1023_s17 }
 0x1d1   :  { %v48_v38 = vpop.permute.xlu0 %47 }
 0x1d2   :  { %v1114_v41 = vmax.f32 %v30_v3, %v48_v38  ;;  %v709_v3 = vld [vmem:[%s1282_s1 + $0x90] sm:$0xff] }
 0x1d3   :  { %v951_v7 = vpack.c.bf16 %v710_v4, %v709_v3  ;;  %v740_v3 = vld [vmem:[%s1285_s4] ss:$0 sm:$0xff] }
 0x1d4   :  { %v103_v44 = vrot.slane %v1114_v41, 7  ;;  %v281_v1 = vrot.slane %v1114_v41, 1 }
 0x1d5   :  { %v50_v42 = vpop.permute.xlu1 %49 }
 0x1d6   :  { %v54_v43 = vmax.f32 %v31_v5, %v50_v42  ;;  %v1164_v5 = vsel %vm88_vm6, 1.0, %v1024_v46 }
 0x1d8   :  { %v104_v45 = vrot.slane %v54_v43, 7  ;;  %v282_v0 = vrot.slane %v54_v43, 1 }
 0x1da   :  { %v107_v51 = vsel %vm105_vm3, %v104_v45, %v103_v44  ;;  %v106_v52 = vsel %vm105_vm3, %v103_v44, %v104_v45  ;;  %v284_v6 = vsel %vm283_vm5, %v281_v1, %v282_v0  ;;  %v285_v15 = vsel %vm283_vm5, %v282_v0, %v281_v1  ;;  %v737_v0 = vld [vmem:[%s1283_s3 + $0xb8] sm:$0xff] }
 0x1db   :  { %v108_v53 = vmul.f32 %v1118_v47, %v107_v51  ;;  %v109_v54 = vmul.f32 %v1120_v48, %v106_v52  ;;  %v286_v8 = vmul.f32 %v1164_v5, %v284_v6  ;;  %v287_v17 = vmul.f32 %v1185_v16, %v285_v15  ;;  %v723_v51 = vld [vmem:[%s1283_s3 + $0x68] sm:$0xff] }
 0x1dc   :  { %v987_v36 = vpack.c.bf16 %v723_v51, %v722_v50  ;;  %v1007_v1 = vpack.c.bf16 %v737_v0, %v736_v63 }
 0x1dd   :  { %817 = vmatprep.mubr.msk.f32.mxu0 %vm118_vm4, %v108_v53  ;;  %v730_v53 = vld [vmem:[%s1283_s3 + $0x80] sm:$0xff] }
 0x1de   :  { %818 = vmatmul.mubr.msk.f32.vlgmr.msra.gmra.mrb[0].mxu0 %vm118_vm4, %v109_v54  ;;  %v731_v54 = vld [vmem:[%s1283_s3 + $0x88] sm:$0xff] }
 0x1df   :  { %934 = vmatpush3.bf16.msra.mxu0 %v931_v24  ;;  %836 = vmatprep.mubr.msk.f32.mxu0 %vm118_vm4, %v1114_v41  ;;  %v718_v24 = vld [vmem:[%s1283_s3 + $0x40] sm:$0xff] }
 0x1e0   :  { %936 = vmatprep.subr.bf16.mxu0 %v935_v55  ;;  %v979_v26 = vpack.c.bf16 %v719_v25, %v718_v24 }
 0x1e2   :  { %980 = vmatprep.subr.bf16.mxu1 %v979_v26 }
 0x1e3   :  { %938 = vmatpush3.bf16.msra.mxu0 %v935_v55  ;;  %v995_v55 = vpack.c.bf16 %v731_v54, %v730_v53 }
 0x1e4   :  { %940 = vmatprep.subr.bf16.mxu0 %v939_v58 }
 0x1e7   :  { %942 = vmatpush3.bf16.msra.mxu0 %v939_v58  ;;  %v999_v58 = vpack.c.bf16 %v733_v57, %v732_v56 }
 0x1e8   :  { %944 = vmatprep.subr.bf16.mxu0 %v943_v61 }
 0x1eb   :  { %946 = vmatpush3.bf16.msra.mxu0 %v943_v61  ;;  %v735_v61 = vld [vmem:[%s1283_s3 + $0xa8] sm:$0xff] }
 0x1ec   :  { %948 = vmatprep.subr.bf16.mxu0 %v947_v2  ;;  %v1003_v62 = vpack.c.bf16 %v735_v61, %v734_v60 }
 0x1ee   :  { %837 = vmatmul.mubr.msk.f32.vlgmr.msra.gmra.mrb[0].mxu0 %vm118_vm4, %v54_v43 }
 0x1ef   :  { %950 = vmatpush3.bf16.msra.mxu0 %v947_v2  ;;  %855 = vmatprep.mubr.msk.f32.mxu0 %vm118_vm4, %v286_v8 }
 0x1f0   :  { %952 = vmatprep.subr.bf16.mxu0 %v951_v7 }
 0x1f3   :  { %954 = vmatpush3.bf16.msra.mxu0 %v951_v7 }
 0x1f4   :  { %956 = vmatprep.subr.bf16.mxu0 %v955_v11 }
 0x1f7   :  { %958 = vmatpush3.bf16.msra.mxu0 %v955_v11 }
 0x1f8   :  { %960 = vmatprep.subr.bf16.mxu0 %v959_v14 }
 0x1fb   :  { %962 = vmatpush3.bf16.msra.mxu0 %v959_v14 }
 0x1fe   :  { %856 = vmatmul.mubr.msk.f32.vlgmr.msra.gmra.mrb[0].mxu0 %vm118_vm4, %v287_v17 }
 0x2d1   :  { %v857_v28 = vpop.f32.mrb[0].mxu0 }
 0x2d2   :  { %v388_v29 = vadd.f32 %v857_v28, %v717_v27  ;;  %v369_v30 = vpop.f32.mrb[1].mxu0 }
 0x2d3   :  { %v387_v31 = vadd.f32 %v717_v27, %v369_v30 }
 0x2d4   :  { %v390_v32 = vmax.f32 %v388_v29, 0.0 }
 0x2d5   :  { %v389_v33 = vmax.f32 %v387_v31, 0.0 }
 0x2d6   :  { %v401_v34 = vrot.slane %v390_v32, 7  ;;  %v577_v35 = vrot.slane %v390_v32, 1 }
 0x2d7   :  { %v400_v37 = vrot.slane %v389_v33, 7  ;;  %v576_v38 = vrot.slane %v389_v33, 1 }
 0x2d9   :  { %v579_v41 = vsel %vm283_vm5, %v577_v35, %v576_v38  ;;  %v403_v42 = vsel %vm105_vm3, %v401_v34, %v400_v37  ;;  %v402_v43 = vsel %vm105_vm3, %v400_v37, %v401_v34  ;;  %v578_v44 = vsel %vm283_vm5, %v576_v38, %v577_v35 }
 0x2da   :  { %v404_v45 = vmul.f32 %v1118_v47, %v403_v42  ;;  %v405_v46 = vmul.f32 %v1120_v48, %v402_v43  ;;  %v724_v47 = vld [vmem:[%s1283_s3 + $0x70] sm:$0xff]  ;;  %v725_v48 = vld [vmem:[%s1283_s3 + $0x78] sm:$0xff]  ;;  %v580_v59 = vmul.f32 %v1164_v5, %v578_v44  ;;  %v581_v2 = vmul.f32 %v1185_v16, %v579_v41 }
 0x2db   :  { %v991_v52 = vpack.c.bf16 %v725_v48, %v724_v47 }
 0x2dc   :  { %874 = vmatprep.mubr.msk.f32.mxu1 %vm118_vm4, %v404_v45 }
 0x2dd   :  { %875 = vmatmul.mubr.msk.f32.vlgmr.msra.gmra.mrb[0].mxu1 %vm118_vm4, %v405_v46 }
 0x2de   :  { %982 = vmatpush3.bf16.msra.mxu1 %v979_v26  ;;  %893 = vmatprep.mubr.msk.f32.mxu1 %vm118_vm4, %v389_v33 }
 0x2df   :  { %984 = vmatprep.subr.bf16.mxu1 %v983_v49 }
 0x2e2   :  { %986 = vmatpush3.bf16.msra.mxu1 %v983_v49 }
 0x2e3   :  { %988 = vmatprep.subr.bf16.mxu1 %v987_v36 }
 0x2e6   :  { %990 = vmatpush3.bf16.msra.mxu1 %v987_v36 }
 0x2e7   :  { %992 = vmatprep.subr.bf16.mxu1 %v991_v52 }
 0x2ea   :  { %994 = vmatpush3.bf16.msra.mxu1 %v991_v52 }
 0x2eb   :  { %996 = vmatprep.subr.bf16.mxu1 %v995_v55 }
 0x2ed   :  { %894 = vmatmul.mubr.msk.f32.vlgmr.msra.gmra.mrb[0].mxu1 %vm118_vm4, %v390_v32 }
 0x2ee   :  { %998 = vmatpush3.bf16.msra.mxu1 %v995_v55  ;;  %912 = vmatprep.mubr.msk.f32.mxu1 %vm118_vm4, %v580_v59 }
 0x2ef   :  { %1000 = vmatprep.subr.bf16.mxu1 %v999_v58 }
 0x2f2   :  { %1002 = vmatpush3.bf16.msra.mxu1 %v999_v58 }
 0x2f3   :  { %1004 = vmatprep.subr.bf16.mxu1 %v1003_v62 }
 0x2f6   :  { %1006 = vmatpush3.bf16.msra.mxu1 %v1003_v62 }
 0x2f7   :  { %1008 = vmatprep.subr.bf16.mxu1 %v1007_v1 }
 0x2fa   :  { %1010 = vmatpush3.bf16.msra.mxu1 %v1007_v1 }
 0x2fd   :  { %913 = vmatmul.mubr.msk.f32.vlgmr.msra.gmra.mrb[0].mxu1 %vm118_vm4, %v581_v2 }
 0x3d0   :  { %v914_v4 = vpop.f32.mrb[0].mxu1 }
 0x3d1   :  { %v682_v5 = vadd.f32 %v914_v4, %v740_v3  ;;  %v663_v6 = vpop.f32.mrb[1].mxu1 }
 0x3d2   :  { %v681_v7 = vadd.f32 %v740_v3, %v663_v6 }
 0x3d3   :  { %v684_v8 = vmax.f32 %v682_v5, 0.0 }
 0x3d4   :  { %v683_v9 = vmax.f32 %v681_v7, 0.0 }
 0x3d5   :  { %686 = vst.msk [vmem:[%s1286_s5 + $0x8] sm:$0xff] %vm118_vm4, %v684_v8 }
 0x3d6   :  { %685 = vst.msk [vmem:[%s1286_s5] sm:$0xff] %vm118_vm4, %v683_v9 }

</bundles_post_ra>
